<compile_context>
chip_gen: v7x
topology: tpu7x:2x2x1
jax: 0.10.0
libtpu: 0.0.40
codegen_flags: <defaults>
</compile_context>

<pallas_src>
import functools
import math

import jax
import jax.numpy as jnp
from jax import lax
from jax.experimental import pallas as pl
from jax.experimental.pallas import tpu as pltpu


def _round_up(x, m):
    return ((x + m - 1) // m) * m


def _lcm(a, b):
    return a * b // math.gcd(a, b)


def _choose_tiling(D, H, W):
    """Pick (Tc, D_pad, H_pad, W_pad, Hc).

    Constraints:
      * W_pad % 8 == 0          -> (Hc, W_pad, Tc) -> (Hc*W_pad, Tc) reshape is free.
      * (Hc * W_pad) % 128 == 0 -> in-kernel lane-dim source slices are 128-aligned.
      * H_pad % Hc == 0         -> every h-chunk is full (no ragged OOB reads).
      * D_pad % 8 == 0          -> channel slabs of the stacked (3*D_pad, HW)
                                    source / accumulator stay sublane-aligned.
      * (D_pad*H_pad*W_pad) % Tc == 0 -> integral number of lane-dense column tiles.
    Padded rows are harmless: clipped sample coordinates give them exactly zero
    tent weight, so values there never propagate into valid voxels.
    """
    W_pad = _round_up(W, 8)
    hc_unit = 128 // math.gcd(W_pad, 128)
    # Keep the (Hc*W_pad, Tc) weight slab around <= ~2 MiB (f32) at Tc = 512.
    max_kc_rows = 1024
    budget_hc = max(hc_unit, (max_kc_rows // W_pad) // hc_unit * hc_unit)
    Hc = min(budget_hc, _round_up(H, hc_unit))
    H_pad = _round_up(H, Hc)
    HWp = H_pad * W_pad

    # Prefer wide (512/256) column tiles for full v6e/v7x MXU N-width, but never at
    # the price of large extra D padding.
    best = None
    for Tc in (512, 256, 128):
        m = Tc // math.gcd(HWp, Tc)
        D_pad = _round_up(D, _lcm(m, 8))
        key = (D_pad * HWp, -Tc)          # minimize padding, then prefer wide tiles
        if best is None or key < best[0]:
            best = (key, Tc, D_pad)
    _, Tc, D_pad = best
    return Tc, D_pad, H_pad, W_pad, Hc


def _diffeo_step_kernel(grid_ref, src_ref, flow_ref, out_ref, acc_ref, *,
                        D, H, W, D_pad, W_pad, Hc, n_hc, use_bf16):
    """One scaling-and-squaring step for one (batch, output-column-tile) block.

    grid_ref : (3, Tc)            normalized meshgrid coords for this column tile
    src_ref  : (1, 3*D_pad, HWp)  stacked-channel flow for this batch (gather source)
    flow_ref : (1, 3, Tc)         current flow at this column tile
    out_ref  : (1, 3, Tc)         flow + grid_sample(flow, grid + flow)
    acc_ref  : (3*D_pad, Tc) f32  VMEM scratch accumulating the (h, w) contraction
    """
    Tc = out_ref.shape[-1]
    Kc = Hc * W_pad
    dot_dtype = jnp.bfloat16 if use_bf16 else jnp.float32

    f = flow_ref[0]                              # (3, Tc) f32
    coords = grid_ref[...] + f

    # grid_sample semantics: align_corners=True unnormalize + border clamp.
    pd = jnp.clip((coords[0:1] + 1.0) * (0.5 * (D - 1)), 0.0, float(D - 1))
    ph = jnp.clip((coords[1:2] + 1.0) * (0.5 * (H - 1)), 0.0, float(H - 1))
    pw = jnp.clip((coords[2:3] + 1.0) * (0.5 * (W - 1)), 0.0, float(W - 1))

    # Separable trilinear tent factors, tent(x) = max(0, 1 - |x|).  Rows beyond the
    # true D/H/W extent get exactly zero weight because p* is clipped above, so the
    # spatial padding (and any stale values living there) never contributes.
    def row_iota(rows):
        return lax.broadcasted_iota(jnp.int32, (rows, Tc), 0).astype(jnp.float32)

    def tent(p, rows):
        return jnp.maximum(0.0, 1.0 - jnp.abs(p - row_iota(rows)))

    t_d = tent(pd, D_pad)                        # (D_pad, Tc), stays f32
    t_w = tent(pw, W_pad)                        # (W_pad, Tc)

    acc_ref[...] = jnp.zeros_like(acc_ref)

    def h_chunk(c, carry):
        # (h, w) weight slab for h-rows [c*Hc, c*Hc + Hc): one multiply per element
        # thanks to separability, then a single fused-channel MXU contraction.
        h0 = (c * Hc).astype(jnp.float32)
        t_h = jnp.maximum(0.0, 1.0 - jnp.abs(ph - (h0 + row_iota(Hc))))   # (Hc, Tc)
        t_hw = (t_h[:, None, :] * t_w[None, :, :]).reshape(Kc, Tc).astype(dot_dtype)
        k0 = pl.multiple_of(c * Kc, 128)
        src_chunk = src_ref[0, :, pl.ds(k0, Kc)].astype(dot_dtype)  # (3*D_pad, Kc)
        acc_ref[...] += jnp.dot(src_chunk, t_hw,
                                preferred_element_type=jnp.float32)
        return carry

    lax.fori_loop(0, n_hc, h_chunk, 0, unroll=n_hc <= 4)

    # Contract the d factor on the VPU (kept in f32) and add the identity term.
    sampled = jnp.sum(acc_ref[...].reshape(3, D_pad, Tc) * t_d[None], axis=1)
    out_ref[0] = f + sampled


def _make_step_call(N, D, H, W, D_pad, H_pad, W_pad, Hc, Tc, use_bf16):
    HWp = H_pad * W_pad
    S_pad = D_pad * HWp
    Kc = Hc * W_pad
    n_hc = H_pad // Hc

    kernel = functools.partial(
        _diffeo_step_kernel, D=D, H=H, W=W, D_pad=D_pad, W_pad=W_pad,
        Hc=Hc, n_hc=n_hc, use_bf16=use_bf16)

    # Batch-resident gather source: its block index never changes with the column
    # tile, so single-buffer it when it is big (halves the largest VMEM resident,
    # which matters most on v7x's 64 MiB / TensorCore).
    # TODO(synk): for very large volumes (e.g. 160x192x224) the 12*D_pad*HWp-byte
    # source no longer fits VMEM at all; it should stay in HBM (memory_space=pl.ANY)
    # with per-d-slab make_async_copy double buffering instead of shrinking Tc.
    src_block_bytes = 3 * D_pad * HWp * 4
    src_kwargs = {}
    if src_block_bytes > 16 * 1024 * 1024 and hasattr(pl, "Buffered"):
        src_kwargs["pipeline_mode"] = pl.Buffered(1)

    # Generation-aware VMEM limit (v7x only has 64 MiB per TensorCore).
    bytes_per = 2 if use_bf16 else 4
    est = ((1 if src_kwargs else 2) * src_block_bytes        # gather source
           + 6 * 3 * Tc * 4                                  # grid/flow/out tiles
           + 3 * D_pad * Tc * 4                              # f32 accumulator scratch
           + (W_pad + D_pad) * Tc * 4                        # t_w / t_d factors
           + 2 * Kc * Tc * (4 + bytes_per)                   # weight slab (+ cast)
           + 3 * D_pad * Kc * (4 + bytes_per)                # source slab (+ cast)
           + (4 << 20))                                      # slack
    try:
        vmem_cap = pltpu.get_tpu_info().vmem_capacity_bytes
    except Exception:  # older jax / query unavailable
        vmem_cap = 128 * 1024 * 1024
    vmem_limit = int(min(max(int(est * 1.25), 32 * 1024 * 1024),
                         int(vmem_cap * 0.9)))

    call = pl.pallas_call(
        kernel,
        out_shape=jax.ShapeDtypeStruct((N, 3, S_pad), jnp.float32),
        grid=(N, S_pad // Tc),
        in_specs=[
            pl.BlockSpec((3, Tc), lambda n, t: (0, t)),                  # meshgrid
            pl.BlockSpec((1, 3 * D_pad, HWp), lambda n, t: (n, 0, 0),
                         **src_kwargs),                                  # gather src
            pl.BlockSpec((1, 3, Tc), lambda n, t: (n, 0, t)),            # flow tile
        ],
        out_specs=pl.BlockSpec((1, 3, Tc), lambda n, t: (n, 0, t)),
        scratch_shapes=[pltpu.VMEM((3 * D_pad, Tc), jnp.float32)],
        compiler_params=pltpu.CompilerParams(
            dimension_semantics=("parallel", "parallel"),
            vmem_limit_bytes=vmem_limit,
        ),
    )

    def step(grid_coords, f_flat):
        # (N, 3, S_pad) -> (N, 3*D_pad, HWp) is a free contiguous reshape; no
        # per-step pad / slice HBM round trips.
        return call(grid_coords, f_flat.reshape(N, 3 * D_pad, HWp), f_flat)

    return step


@functools.partial(jax.jit, static_argnames=("time_step", "use_bf16"))
def diffeomorphic_transform(flow, time_step=7, use_bf16=False):
    """Pallas forward pass.  flow: (N, 3, D, H, W) float32, NCDHW layout.

    use_bf16=True runs the big (3*D, HW) x (HW, Tc) contraction with bf16 MXU
    operands (~3x throughput) at ~1e-2 relative error after 7 squarings; the
    default keeps f32 so the output matches the PyTorch reference to ~1e-5.
    """
    N, C, D, H, W = flow.shape
    assert C == 3, "flow must have 3 displacement channels (d, h, w)"

    Tc, D_pad, H_pad, W_pad, Hc = _choose_tiling(D, H, W)
    HWp = H_pad * W_pad
    S_pad = D_pad * HWp

    # Identity grid in normalized [-1, 1] coords; zero at padded voxels (their
    # values are never read with nonzero weight and are sliced off at the end).
    def axis_coords(n, n_pad):
        return jnp.pad(jnp.linspace(-1.0, 1.0, n), (0, n_pad - n))

    gd, gh, gw = axis_coords(D, D_pad), axis_coords(H, H_pad), axis_coords(W, W_pad)
    shape3 = (D_pad, H_pad, W_pad)
    grid_coords = jnp.stack([
        jnp.broadcast_to(gd[:, None, None], shape3),
        jnp.broadcast_to(gh[None, :, None], shape3),
        jnp.broadcast_to(gw[None, None, :], shape3),
    ]).reshape(3, S_pad).astype(jnp.float32)

    f = flow.astype(jnp.float32) * (1.0 / (2.0 ** time_step))
    f = jnp.pad(f, ((0, 0), (0, 0), (0, D_pad - D), (0, H_pad - H), (0, W_pad - W)))
    f = f.reshape(N, 3, S_pad)

    step = _make_step_call(N, D, H, W, D_pad, H_pad, W_pad, Hc, Tc, use_bf16)
    f = lax.fori_loop(0, time_step, lambda i, cur: step(grid_coords, cur), f)

    return f.reshape(N, 3, D_pad, H_pad, W_pad)[:, :, :D, :H, :W]


def _normalized_grid(D, H, W):
    gd, gh, gw = jnp.meshgrid(
        jnp.linspace(-1.0, 1.0, D),
        jnp.linspace(-1.0, 1.0, H),
        jnp.linspace(-1.0, 1.0, W),
        indexing="ij",
    )
    return jnp.stack(
        [gd.reshape(-1), gh.reshape(-1), gw.reshape(-1)], axis=0
    ).astype(jnp.float32)  # (3, S)


def diffeomorphic_transform_ref(flow, time_step=7):
    """Pure-JAX reference (same math as torch.nn.functional.grid_sample path)."""
    N, C, D, H, W = flow.shape
    g = _normalized_grid(D, H, W)[None]                      # (1, 3, S)
    f = flow.reshape(N, 3, D * H * W).astype(jnp.float32) / (2.0 ** time_step)

    def gather(vol, idx):  # vol (N,3,S), idx (N,S) -> (N,3,S)
        return jax.vmap(lambda v, i: v[:, i])(vol, idx)

    for _ in range(time_step):
        coords = g + f
        pd = jnp.clip((coords[:, 0] + 1.0) * 0.5 * (D - 1), 0.0, D - 1.0)
        ph = jnp.clip((coords[:, 1] + 1.0) * 0.5 * (H - 1), 0.0, H - 1.0)
        pw = jnp.clip((coords[:, 2] + 1.0) * 0.5 * (W - 1), 0.0, W - 1.0)
        d0f, h0f, w0f = jnp.floor(pd), jnp.floor(ph), jnp.floor(pw)
        wd1, wh1, ww1 = pd - d0f, ph - h0f, pw - w0f
        wd0, wh0, ww0 = 1.0 - wd1, 1.0 - wh1, 1.0 - ww1
        d0 = d0f.astype(jnp.int32); d1 = jnp.minimum(d0 + 1, D - 1)
        h0 = h0f.astype(jnp.int32); h1 = jnp.minimum(h0 + 1, H - 1)
        w0 = w0f.astype(jnp.int32); w1 = jnp.minimum(w0 + 1, W - 1)

        sampled = jnp.zeros_like(f)
        for di, wdi in ((d0, wd0), (d1, wd1)):
            for hi, whi in ((h0, wh0), (h1, wh1)):
                for wi, wwi in ((w0, ww0), (w1, ww1)):
                    idx = di * (H * W) + hi * W + wi
                    sampled = sampled + (wdi * whi * wwi)[:, None, :] * gather(f, idx)
        f = f + sampled
    return f.reshape(N, 3, D, H, W)


if __name__ == "__main__":
    key = jax.random.PRNGKey(0)
    # Non-cubic, non-128-multiple volume to exercise the padded lane-aligned path.
    N, C, D, H, W = 2, 3, 6, 8, 10
    # Small displacements in normalized [-1, 1] coordinates, like a real velocity field.
    flow = 0.2 * jax.random.normal(key, (N, C, D, H, W), dtype=jnp.float32)

    out = jax.block_until_ready(diffeomorphic_transform(flow, time_step=7))
    assert out.shape == (N, C, D, H, W)

    ref = diffeomorphic_transform_ref(flow, time_step=7)
    max_err = float(jnp.max(jnp.abs(out - ref)))
    assert jnp.allclose(out, ref, rtol=1e-4, atol=1e-4), f"f32 path max |diff| {max_err}"

    # Reduced-precision MXU path (review suggestion), validated at a looser bound:
    # the quantized trilinear weights no longer sum to exactly 1, so the ~7
    # squarings accumulate O(1e-2) relative error -> it stays opt-in.
    out_bf16 = jax.block_until_ready(
        diffeomorphic_transform(flow, time_step=7, use_bf16=True))
    max_err_bf16 = float(jnp.max(jnp.abs(out_bf16 - ref)))
    assert max_err_bf16 < 5e-2, f"bf16 path max |diff| {max_err_bf16}"

    print("KERNEL_OK")
</pallas_src>

<mosaic_0001>
module attributes {stable_mosaic.version = 11 : i64} {
  func.func @_diffeo_step_kernel(%arg0: i32, %arg1: i32, %arg2: memref<3x512xf32, #tpu.memory_space<vmem>>, %arg3: memref<1x24x128xf32, #tpu.memory_space<vmem>>, %arg4: memref<1x3x512xf32, #tpu.memory_space<vmem>>, %arg5: memref<1x3x512xf32, #tpu.memory_space<vmem>>, %arg6: memref<24x512xf32, #tpu.memory_space<vmem>>) attributes {dimension_semantics = [#tpu.dimension_semantics<parallel>, #tpu.dimension_semantics<parallel>], iteration_bounds = array<i64: 2, 2>, scalar_prefetch = 0 : i64, scratch_operands = 1 : i64, tpu.core_type = #tpu.core_type<tc>, window_params = [{transform_indices = @transform_0, window_bounds = array<i64: 3, 512>}, {transform_indices = @transform_1, window_bounds = array<i64: 1, 24, 128>}, {transform_indices = @transform_2, window_bounds = array<i64: 1, 3, 512>}, {transform_indices = @transform_3, window_bounds = array<i64: 1, 3, 512>}]} {
    %c0 = arith.constant 0 : index
    %c0_0 = arith.constant 0 : index
    %c0_1 = arith.constant 0 : index
    %0 = vector.load %arg4[%c0, %c0_0, %c0_1] : memref<1x3x512xf32, #tpu.memory_space<vmem>>, vector<1x3x512xf32>
    %1 = vector.shape_cast %0 : vector<1x3x512xf32> to vector<3x512xf32>
    %c0_2 = arith.constant 0 : index
    %c0_3 = arith.constant 0 : index
    %2 = vector.load %arg2[%c0_2, %c0_3] : memref<3x512xf32, #tpu.memory_space<vmem>>, vector<3x512xf32>
    %3 = arith.addf %2, %1 : vector<3x512xf32>
    %4 = vector.extract_strided_slice %3 {offsets = [0, 0], sizes = [1, 512], strides = [1, 1]} : vector<3x512xf32> to vector<1x512xf32>
    %cst = arith.constant 1.000000e+00 : f32
    %5 = vector.broadcast %cst : f32 to vector<1x512xf32>
    %6 = arith.addf %4, %5 : vector<1x512xf32>
    %cst_4 = arith.constant 2.500000e+00 : f32
    %7 = vector.broadcast %cst_4 : f32 to vector<1x512xf32>
    %8 = arith.mulf %6, %7 : vector<1x512xf32>
    %cst_5 = arith.constant 0.000000e+00 : f32
    %cst_6 = arith.constant 5.000000e+00 : f32
    %9 = vector.broadcast %cst_5 : f32 to vector<1x512xf32>
    %10 = arith.maximumf %9, %8 : vector<1x512xf32>
    %11 = vector.broadcast %cst_6 : f32 to vector<1x512xf32>
    %12 = arith.minimumf %11, %10 : vector<1x512xf32>
    %13 = vector.extract_strided_slice %3 {offsets = [1, 0], sizes = [1, 512], strides = [1, 1]} : vector<3x512xf32> to vector<1x512xf32>
    %cst_7 = arith.constant 1.000000e+00 : f32
    %14 = vector.broadcast %cst_7 : f32 to vector<1x512xf32>
    %15 = arith.addf %13, %14 : vector<1x512xf32>
    %cst_8 = arith.constant 3.500000e+00 : f32
    %16 = vector.broadcast %cst_8 : f32 to vector<1x512xf32>
    %17 = arith.mulf %15, %16 : vector<1x512xf32>
    %cst_9 = arith.constant 0.000000e+00 : f32
    %cst_10 = arith.constant 7.000000e+00 : f32
    %18 = vector.broadcast %cst_9 : f32 to vector<1x512xf32>
    %19 = arith.maximumf %18, %17 : vector<1x512xf32>
    %20 = vector.broadcast %cst_10 : f32 to vector<1x512xf32>
    %21 = arith.minimumf %20, %19 : vector<1x512xf32>
    %22 = vector.extract_strided_slice %3 {offsets = [2, 0], sizes = [1, 512], strides = [1, 1]} : vector<3x512xf32> to vector<1x512xf32>
    %cst_11 = arith.constant 1.000000e+00 : f32
    %23 = vector.broadcast %cst_11 : f32 to vector<1x512xf32>
    %24 = arith.addf %22, %23 : vector<1x512xf32>
    %cst_12 = arith.constant 4.500000e+00 : f32
    %25 = vector.broadcast %cst_12 : f32 to vector<1x512xf32>
    %26 = arith.mulf %24, %25 : vector<1x512xf32>
    %cst_13 = arith.constant 0.000000e+00 : f32
    %cst_14 = arith.constant 9.000000e+00 : f32
    %27 = vector.broadcast %cst_13 : f32 to vector<1x512xf32>
    %28 = arith.maximumf %27, %26 : vector<1x512xf32>
    %29 = vector.broadcast %cst_14 : f32 to vector<1x512xf32>
    %30 = arith.minimumf %29, %28 : vector<1x512xf32>
    %31 = tpu.iota {dimensions = array<i32: 0>} : vector<8x512xi32>
    %32 = arith.sitofp %31 : vector<8x512xi32> to vector<8x512xf32>
    %33 = vector.broadcast %12 : vector<1x512xf32> to vector<8x512xf32>
    %34 = arith.subf %33, %32 : vector<8x512xf32>
    %35 = math.absf %34 : vector<8x512xf32>
    %cst_15 = arith.constant 1.000000e+00 : f32
    %36 = vector.broadcast %cst_15 : f32 to vector<8x512xf32>
    %37 = arith.subf %36, %35 : vector<8x512xf32>
    %cst_16 = arith.constant 0.000000e+00 : f32
    %38 = vector.broadcast %cst_16 : f32 to vector<8x512xf32>
    %39 = arith.maximumf %38, %37 : vector<8x512xf32>
    %40 = tpu.iota {dimensions = array<i32: 0>} : vector<16x512xi32>
    %41 = arith.sitofp %40 : vector<16x512xi32> to vector<16x512xf32>
    %42 = vector.broadcast %30 : vector<1x512xf32> to vector<16x512xf32>
    %43 = arith.subf %42, %41 : vector<16x512xf32>
    %44 = math.absf %43 : vector<16x512xf32>
    %cst_17 = arith.constant 1.000000e+00 : f32
    %45 = vector.broadcast %cst_17 : f32 to vector<16x512xf32>
    %46 = arith.subf %45, %44 : vector<16x512xf32>
    %cst_18 = arith.constant 0.000000e+00 : f32
    %47 = vector.broadcast %cst_18 : f32 to vector<16x512xf32>
    %48 = arith.maximumf %47, %46 : vector<16x512xf32>
    %cst_19 = arith.constant 0.000000e+00 : f32
    %49 = vector.broadcast %cst_19 : f32 to vector<24x512xf32>
    %c0_20 = arith.constant 0 : index
    %c0_21 = arith.constant 0 : index
    %50 = vector.load %arg6[%c0_20, %c0_21] : memref<24x512xf32, #tpu.memory_space<vmem>>, vector<24x512xf32>
    tpu.vector_store %arg6[%c0_20, %c0_21], %49 {strides = array<i32>} : memref<24x512xf32, #tpu.memory_space<vmem>>, vector<24x512xf32>,
    %c0_i32 = arith.constant 0 : i32
    %c8_i32 = arith.constant 8 : i32
    %51 = arith.muli %c0_i32, %c8_i32 : i32
    %52 = arith.sitofp %51 : i32 to f32
    %53 = tpu.iota {dimensions = array<i32: 0>} : vector<8x512xi32>
    %54 = arith.sitofp %53 : vector<8x512xi32> to vector<8x512xf32>
    %55 = vector.broadcast %52 : f32 to vector<8x512xf32>
    %56 = arith.addf %55, %54 : vector<8x512xf32>
    %57 = vector.broadcast %21 : vector<1x512xf32> to vector<8x512xf32>
    %58 = arith.subf %57, %56 : vector<8x512xf32>
    %59 = math.absf %58 : vector<8x512xf32>
    %cst_22 = arith.constant 1.000000e+00 : f32
    %60 = vector.broadcast %cst_22 : f32 to vector<8x512xf32>
    %61 = arith.subf %60, %59 : vector<8x512xf32>
    %cst_23 = arith.constant 0.000000e+00 : f32
    %62 = vector.broadcast %cst_23 : f32 to vector<8x512xf32>
    %63 = arith.maximumf %62, %61 : vector<8x512xf32>
    %64 = vector.shape_cast %63 : vector<8x512xf32> to vector<8x1x512xf32>
    %65 = vector.shape_cast %48 : vector<16x512xf32> to vector<1x16x512xf32>
    %66 = vector.broadcast %64 : vector<8x1x512xf32> to vector<8x16x512xf32>
    %67 = vector.broadcast %65 : vector<1x16x512xf32> to vector<8x16x512xf32>
    %68 = arith.mulf %66, %67 : vector<8x16x512xf32>
    %69 = vector.shape_cast %68 : vector<8x16x512xf32> to vector<128x512xf32>
    %c128_i32 = arith.constant 128 : i32
    %70 = arith.muli %c0_i32, %c128_i32 : i32
    %71 = tpu.assume_multiple %70, 128 : i32
    %c0_24 = arith.constant 0 : index
    %c0_25 = arith.constant 0 : index
    %72 = arith.index_cast %71 : i32 to index
    %73 = vector.load %arg3[%c0_24, %c0_25, %72] : memref<1x24x128xf32, #tpu.memory_space<vmem>>, vector<1x24x128xf32>
    %74 = vector.shape_cast %73 : vector<1x24x128xf32> to vector<24x128xf32>
    %c0_26 = arith.constant 0 : index
    %c0_27 = arith.constant 0 : index
    %75 = vector.load %arg6[%c0_26, %c0_27] : memref<24x512xf32, #tpu.memory_space<vmem>>, vector<24x512xf32>
    %cst_28 = arith.constant dense<0.000000e+00> : vector<24x512xf32>
    %76 = tpu.matmul %74, %69, %cst_28 {dimension_numbers = #tpu.dot_dimension_numbers<[1], [0], [0], [1], [0, 0, 1, 1], [], []>} : vector<24x128xf32>, vector<128x512xf32>, vector<24x512xf32> -> vector<24x512xf32>
    %77 = arith.addf %75, %76 : vector<24x512xf32>
    %c0_29 = arith.constant 0 : index
    %c0_30 = arith.constant 0 : index
    %78 = vector.load %arg6[%c0_29, %c0_30] : memref<24x512xf32, #tpu.memory_space<vmem>>, vector<24x512xf32>
    tpu.vector_store %arg6[%c0_29, %c0_30], %77 {strides = array<i32>} : memref<24x512xf32, #tpu.memory_space<vmem>>, vector<24x512xf32>,
    %c1_i32 = arith.constant 1 : i32
    %c0_31 = arith.constant 0 : index
    %c0_32 = arith.constant 0 : index
    %79 = vector.load %arg6[%c0_31, %c0_32] : memref<24x512xf32, #tpu.memory_space<vmem>>, vector<24x512xf32>
    %80 = vector.shape_cast %79 : vector<24x512xf32> to vector<3x8x512xf32>
    %81 = vector.shape_cast %39 : vector<8x512xf32> to vector<1x8x512xf32>
    %82 = vector.broadcast %81 : vector<1x8x512xf32> to vector<3x8x512xf32>
    %83 = arith.mulf %80, %82 : vector<3x8x512xf32>
    %cst_33 = arith.constant dense<0.000000e+00> : vector<3x512xf32>
    %84 = vector.multi_reduction <add>, %83, %cst_33 [1] : vector<3x8x512xf32> to vector<3x512xf32>
    %85 = arith.addf %1, %84 : vector<3x512xf32>
    %c0_34 = arith.constant 0 : index
    %c0_35 = arith.constant 0 : index
    %c0_36 = arith.constant 0 : index
    %86 = vector.load %arg5[%c0_34, %c0_35, %c0_36] : memref<1x3x512xf32, #tpu.memory_space<vmem>>, vector<1x3x512xf32>
    %87 = vector.shape_cast %86 : vector<1x3x512xf32> to vector<3x512xf32>
    %88 = vector.shape_cast %85 : vector<3x512xf32> to vector<1x3x512xf32>
    tpu.vector_store %arg5[%c0_34, %c0_35, %c0_36], %88 {strides = array<i32>} : memref<1x3x512xf32, #tpu.memory_space<vmem>>, vector<1x3x512xf32>,
    return
  }
  func.func @transform_0(%arg0: i32, %arg1: i32) -> (i32, i32) {
    %c0_i32 = arith.constant 0 : i32
    %c0_i32_0 = arith.constant 0 : i32
    return %c0_i32, %arg1 : i32, i32
  }
  func.func @transform_1(%arg0: i32, %arg1: i32) -> (i32, i32, i32) {
    %c0_i32 = arith.constant 0 : i32
    %c0_i32_0 = arith.constant 0 : i32
    %c0_i32_1 = arith.constant 0 : i32
    return %arg0, %c0_i32, %c0_i32_0 : i32, i32, i32
  }
  func.func @transform_2(%arg0: i32, %arg1: i32) -> (i32, i32, i32) {
    %c0_i32 = arith.constant 0 : i32
    %c0_i32_0 = arith.constant 0 : i32
    return %arg0, %c0_i32, %arg1 : i32, i32, i32
  }
  func.func @transform_3(%arg0: i32, %arg1: i32) -> (i32, i32, i32) {
    %c0_i32 = arith.constant 0 : i32
    %c0_i32_0 = arith.constant 0 : i32
    return %arg0, %c0_i32, %arg1 : i32, i32, i32
  }
}

</mosaic_0001>

<bundles_post_ra>
// kernel: closed_call.4
= control target key start
LH: loop header
LB: loop body
LE: loop exit
PB: predicated region body
PF: predicated region fallthrough
CT: control target
= control target key end

     0   :  { %s1410_s12 = smov 0   ;;  %s1412_s13 = smov 0   ;;  %s1720_s0 = inlined_call_operand.vmem [shape: f32[3,1024], index: 0, kind: input, shape index: {}]   ;;  %s1721_s1 = inlined_call_operand.vmem [shape: f32[2,24,128], index: 1, kind: input, shape index: {}]   ;;  %s1722_s2 = inlined_call_operand.vmem [shape: f32[2,3,1024], index: 2, kind: input, shape index: {}]   ;;  %s1723_s3 = inlined_call_operand.vmem [shape: f32[2,3,1024], index: 3, kind: output, shape index: {}]  }
   0x1   :  { %s1414_s14 = smov 0   ;;  %s1416_s15 = smov 0  }
   0x2   :  { %s1418_s16 = smov 0  }
   0x3 LB: > { %s22_s17 = sadd.s32 1, %s1378_s14  ;;  %s25_s18 = sadd.s32 1, %s1382_s15  ;;  %s1386_s16 = sphi %s1418_s16, %s13_s16   ;;  %s1382_s15 = sphi %s1416_s15, %s1727_s15   ;;  %s1378_s14 = sphi %s1414_s14, %s1726_s14   ;;  %s1374_s13 = sphi %s1412_s13, %s1725_s13   ;;  %s1370_s12 = sphi %s1410_s12, %s1724_s12  }
   0x4   : > { %p23_p0 = scmp.ge.s32.totalorder %s22_s17, 2  ;;  %p1229_p1 = scmp.ge.s32.totalorder %s1386_s16, 1 }
   0x5   : > { %p179_p2 = scmp.lt.s32.totalorder %s1386_s16, 5 }
   0x6   : > { %s1729_s17 = smov (%p23_p0, %s22_s17), 0  ;;  %s1731_s18 = smov (!%p23_p0, %s25_s18), %s1382_s15 }
   0x7   : > { %p180_p3 = pnand %p1229_p1, %p179_p2  ;;  %p27_p4 = scmp.ge.s32.totalorder %s1731_s18, 2 }
   0x8   : > { %s1230_s19 = sshll.u32 (!%p180_p3), %s1370_s12, 2  ;;  %p227_p5 = scmp.lt.s32.totalorder (!%p180_p3), %s1374_s13, 1  ;;  %v1388_v0 = vmov (!%p180_p3), 0.0   ;;  %v278_v1 = vlaneseq (!%p180_p3)  ;;  %v1389_v35 = vmov (!%p180_p3), 1966171168   ;;  %vm1090_vm0 = vcmask (!%p180_p3), 1041409  }
   0x9   : > { %s1733_s18 = smov (%p27_p4, %s1731_s18), 0  ;;  %183 = sbr.rel (%p180_p3) target bundleno = 348 (0x15c), region = 32 }
   0xa   : > { %p222_p6 = scmp.lt.s32.totalorder (!%p180_p3), %s1230_s19, 7  ;;  %849 = vmatprep.mubr.f32.mxu0 (!%p180_p3), %v1388_v0  ;;  %932 = vmatprep.mubr.f32.mxu1 (!%p180_p3), %v1388_v0  ;;  %v1462_v8 = vshrl.u32 (!%p180_p3), %v278_v1, 7  ;;  %v483_v36 = vunpack.c.l.s4 (!%p180_p3), %v1389_v35  ;;  %vm1092_vm1 = vcmask (!%p180_p3), 1045509   ;;  %vm1095_vm2 = vcmask (!%p180_p3), 1042434  }
   0xb   : > { %vm1097_vm3 = vcmask (!%p180_p3), 1046534  }
   0xc   : > { %v335_v15 = vadd.s32 (!%p180_p3), 8, %v1462_v8  ;;  %v345_v16 = vsub.s32 (!%p180_p3), 6, %v1462_v8  ;;  %v1475_v17 = vsub.s32 (!%p180_p3), 1, %v1462_v8  ;;  %v428_v18 = vsub.s32 (!%p180_p3), 5, %v1462_v8 }
   0xd   : > { %v1479_v23 = vsub.s32 (!%p180_p3), 2, %v1462_v8  ;;  %v1482_v28 = vcvt.s32.f32 (!%p180_p3), %v1462_v8  ;;  %v484_v58 = vunpack.c.0.s8 (!%p180_p3), %v483_v36 }
   0xe   : > { %v1484_v29 = vcvt.s32.f32 (!%p180_p3), %v335_v15 }
   0xf   : > { %v1509_v15 = vsub.s32 (!%p180_p3), %v484_v58, %v1462_v8 }
  0x10   : > { %s1735_s13 = smov (!%p227_p5, %s1374_s13), 1  ;;  %s1737_s19 = smov (!%p222_p6, %s1230_s19), 7 }
  0x11   : > { %s1234_s20 = sshll.u32 %s1735_s13, 3  ;;  %s1231_s21 = sshll.u32 %s1737_s19, 2 }
  0x12   : > { %s1445_s22 = sadd.s32 %s1234_s20, %s1737_s19  ;;  %s225_s25 = scalar_lea.vmem %s1720_s0, %s1231_s21 }
  0x13   : > { %s1235_s26 = sshll.u32 %s1445_s22, 2  ;;  %v254_v2 = vld [vmem:[%s225_s25] sm:$0x77]  ;;  %v255_v3 = vld [vmem:[%s225_s25 + $0x8] sm:$0x77]  ;;  %s1305_s30 = smul.u32 24, %s1735_s13 }
  0x14   : > { %s240_s29 = scalar_lea.vmem %s1722_s2, %s1235_s26  ;;  %s250_s9 = scalar_lea.vmem %s1723_s3, %s1235_s26 }
  0x15   : > { %v1456_v4 = vld [vmem:[%s240_s29] sm:$0x77]  ;;  %v1458_v5 = vld [vmem:[%s240_s29 + $0x8] sm:$0x77]  ;;  %s231_s6 = scalar_lea.vmem %s1721_s1, %s1305_s30 }
  0x16   : > { %v256_v6 = vadd.f32 %v254_v2, %v1456_v4  ;;  %v257_v7 = vadd.f32 %v255_v3, %v1458_v5 }
  0x18   : > { %v1464_v9 = vadd.f32 1.0, %v256_v6  ;;  %v1466_v10 = vadd.f32 1.0, %v257_v7 }
  0x1a   : > { %v266_v11 = vmul.f32 3.5, %v1464_v9  ;;  %v267_v12 = vmul.f32 3.5, %v1466_v10  ;;  %v272_v13 = vmul.f32 4.5, %v1464_v9  ;;  %v273_v14 = vmul.f32 4.5, %v1466_v10 }
  0x1c   : > { %v268_v19 = vmax.f32 %v266_v11, 0.0  ;;  %v269_v20 = vmax.f32 %v267_v12, 0.0  ;;  %v274_v21 = vmax.f32 %v272_v13, 0.0  ;;  %v275_v22 = vmax.f32 %v273_v14, 0.0 }
  0x1e   : > { %v270_v24 = vmin.f32 %v268_v19, 7.0  ;;  %v271_v25 = vmin.f32 %v269_v20, 7.0  ;;  %v276_v26 = vmin.f32 %v274_v21, 9.0  ;;  %v277_v27 = vmin.f32 %v275_v22, 9.0 }
  0x20   : > { %v346_v30 = vrot.slane %v276_v26, %v345_v16  ;;  %v425_v31 = vrot.slane %v270_v24, %v1475_v17  ;;  %v429_v32 = vrot.slane %v270_v24, %v428_v18  ;;  %v433_v33 = vrot.slane %v271_v25, %v1475_v17 }
  0x21   : > { %v437_v34 = vrot.slane %v271_v25, %v428_v18  ;;  %v354_v37 = vrot.slane %v277_v27, %v345_v16  ;;  %v342_v38 = vrot.slane %v276_v26, %v1479_v23  ;;  %v350_v46 = vrot.slane %v277_v27, %v1479_v23 }
  0x22   : > { %v366_v39 = vrot.slane %v346_v30, %v1479_v23  ;;  %v445_v40 = vrot.slane %v425_v31, %v1475_v17  ;;  %v449_v41 = vrot.slane %v429_v32, %v1475_v17  ;;  %v453_v42 = vrot.slane %v433_v33, %v1475_v17 }
  0x23   : > { %v457_v43 = vrot.slane %v437_v34, %v1475_v17  ;;  %v374_v44 = vrot.slane %v354_v37, %v1479_v23  ;;  %v362_v45 = vrot.slane %v342_v38, %v1479_v23  ;;  %v370_v62 = vrot.slane %v350_v46, %v1479_v23 }
  0x24   : > { %v376_v47 = vsub.f32 %v366_v39, %v1482_v28  ;;  %v380_v48 = vsub.f32 %v366_v39, %v1484_v29  ;;  %v458_v49 = vsub.f32 %v445_v40, %v1482_v28  ;;  %v459_v50 = vsub.f32 %v449_v41, %v1482_v28 }
  0x25   : > { %v460_v51 = vsub.f32 %v453_v42, %v1482_v28  ;;  %v461_v52 = vsub.f32 %v457_v43, %v1482_v28  ;;  %v378_v53 = vsub.f32 %v374_v44, %v1482_v28  ;;  %v382_v54 = vsub.f32 %v374_v44, %v1484_v29 }
  0x26   : > { %v384_v55 = vand.u32 2147483647, %v376_v47  ;;  %v388_v56 = vand.u32 2147483647, %v380_v48  ;;  %v462_v57 = vand.u32 2147483647, %v458_v49  ;;  %v375_v2 = vsub.f32 %v362_v45, %v1482_v28 }
  0x27   : > { %v463_v59 = vand.u32 2147483647, %v459_v50  ;;  %v464_v60 = vand.u32 2147483647, %v460_v51  ;;  %v465_v61 = vand.u32 2147483647, %v461_v52  ;;  %v379_v3 = vsub.f32 %v362_v45, %v1484_v29 }
  0x28   : > { %v466_v63 = vsub.f32 1.0, %v462_v57  ;;  %v386_v1 = vand.u32 2147483647, %v378_v53  ;;  %v390_v12 = vand.u32 2147483647, %v382_v54  ;;  %v392_v13 = vsub.f32 1.0, %v384_v55 }
  0x29   : > { %v467_v6 = vsub.f32 1.0, %v463_v59  ;;  %v468_v7 = vsub.f32 1.0, %v464_v60  ;;  %v469_v11 = vsub.f32 1.0, %v465_v61  ;;  %v396_v16 = vsub.f32 1.0, %v388_v56 }
  0x2a   : > { %v470_v14 = vmax.f32 %v466_v63, 0.0  ;;  %v394_v21 = vsub.f32 1.0, %v386_v1  ;;  %v383_v22 = vand.u32 2147483647, %v375_v2  ;;  %v387_v24 = vand.u32 2147483647, %v379_v3 }
  0x2b   : > { %v471_v18 = vmax.f32 %v467_v6, 0.0  ;;  %v472_v19 = vmax.f32 %v468_v7, 0.0  ;;  %v473_v20 = vmax.f32 %v469_v11, 0.0  ;;  %v377_v25 = vsub.f32 %v370_v62, %v1482_v28 }
  0x2c   : > { %v398_v30 = vsub.f32 1.0, %v390_v12  ;;  %v381_v31 = vsub.f32 %v370_v62, %v1484_v29  ;;  %v391_v32 = vsub.f32 1.0, %v383_v22  ;;  %v395_v33 = vsub.f32 1.0, %v387_v24 }
  0x2d   : > { %v478_v26 = vcombine.low %v470_v14, %v471_v18  ;;  %v480_v27 = vcombine.low %v472_v19, %v473_v20  ;;  %v385_v34 = vand.u32 2147483647, %v377_v25  ;;  %v479_v35 = vcombine.high %v470_v14, %v471_v18 }
  0x2e   : > { %v389_v38 = vand.u32 2147483647, %v381_v31  ;;  %v481_v39 = vcombine.high %v472_v19, %v473_v20  ;;  %v1516_v40 = vsub.s32 3, %v1462_v8  ;;  %v1519_v41 = vsub.s32 0, %v1462_v8 }
  0x2f   : > { %v488_v36 = vrot.slane %v478_v26, %v1509_v15  ;;  %v502_v37 = vrot.slane %v480_v27, %v1509_v15  ;;  %v393_v42 = vsub.f32 1.0, %v385_v34  ;;  %v495_v43 = vrot.slane %v479_v35, %v1509_v15 }
  0x30   : > { %v397_v44 = vsub.f32 1.0, %v389_v38  ;;  %v509_v46 = vrot.slane %v481_v39, %v1509_v15  ;;  %v1523_v47 = vmax.f32 %v392_v13, 0.0  ;;  %v1525_v48 = vmax.f32 %v396_v16, 0.0 }
  0x31   : > { %v510_v29 = vcombine.low %v488_v36, %v502_v37  ;;  %v511_v45 = vcombine.high %v488_v36, %v502_v37  ;;  %v1527_v49 = vmax.f32 %v394_v21, 0.0  ;;  %v1529_v50 = vmax.f32 %v398_v30, 0.0 }
  0x32   : > { %v1532_v52 = vmax.f32 %v391_v32, 0.0  ;;  %v1534_v53 = vmax.f32 %v395_v33, 0.0  ;;  %v1537_v55 = vmax.f32 %v393_v42, 0.0  ;;  %v1539_v56 = vmax.f32 %v397_v44, 0.0 }
  0x33   : > { %v520_v51 = vrot.slane %v510_v29, %v1509_v15  ;;  %v534_v54 = vrot.slane %v511_v45, %v1509_v15  ;;  %v512_v57 = vcombine.low %v495_v43, %v509_v46  ;;  %v513_v58 = vcombine.high %v495_v43, %v509_v46 }
  0x35   : > { %v553_v59 = vrot.slane %v520_v51, %v1475_v17  ;;  %v561_v60 = vrot.slane %v520_v51, %v1516_v40  ;;  %v549_v61 = vrot.slane %v520_v51, %v1519_v41  ;;  %v557_v62 = vrot.slane %v520_v51, %v1479_v23 }
  0x36   : > { %v569_v63 = vrot.slane %v534_v54, %v1475_v17  ;;  %v577_v1 = vrot.slane %v534_v54, %v1516_v40  ;;  %v565_v2 = vrot.slane %v534_v54, %v1519_v41  ;;  %v573_v3 = vrot.slane %v534_v54, %v1479_v23 }
  0x37   : > { %v707_v6 = vmul.f32 %v553_v59, %v1523_v47  ;;  %v711_v7 = vmul.f32 %v553_v59, %v1525_v48  ;;  %v709_v11 = vmul.f32 %v561_v60, %v1527_v49  ;;  %v713_v12 = vmul.f32 %v561_v60, %v1529_v50 }
  0x38   : > { %v706_v13 = vmul.f32 %v549_v61, %v1532_v52  ;;  %v710_v14 = vmul.f32 %v549_v61, %v1534_v53  ;;  %v708_v16 = vmul.f32 %v557_v62, %v1537_v55  ;;  %v712_v18 = vmul.f32 %v557_v62, %v1539_v56 }
  0x39   : > { %v1241_v19 = vpack.c.bf16 %v711_v7, %v707_v6  ;;  %v1273_v20 = vpack.c.bf16 %v713_v12, %v709_v11  ;;  %v715_v21 = vmul.f32 %v569_v63, %v1523_v47  ;;  %v719_v22 = vmul.f32 %v569_v63, %v1525_v48 }
  0x3a   : > { %v1243_v24 = vpack.c.bf16 %v710_v14, %v706_v13  ;;  %v1275_v25 = vpack.c.bf16 %v712_v18, %v708_v16  ;;  %v717_v26 = vmul.f32 %v577_v1, %v1527_v49  ;;  %v721_v27 = vmul.f32 %v577_v1, %v1529_v50 }
  0x3b   : > { %1242 = vmatprep.subr.bf16.mxu0 %v1241_v19  ;;  %1274 = vmatprep.subr.bf16.mxu1 %v1273_v20  ;;  %v1245_v30 = vpack.c.bf16 %v719_v22, %v715_v21  ;;  %v714_v31 = vmul.f32 %v565_v2, %v1532_v52  ;;  %v718_v32 = vmul.f32 %v565_v2, %v1534_v53 }
  0x3c   : > { %1244 = vmatpush1.bf16.msra.mxu0 %v1243_v24  ;;  %1276 = vmatpush1.bf16.msra.mxu1 %v1275_v25  ;;  %v1277_v33 = vpack.c.bf16 %v721_v27, %v717_v26  ;;  %v716_v34 = vmul.f32 %v573_v3, %v1537_v55  ;;  %v720_v35 = vmul.f32 %v573_v3, %v1539_v56 }
  0x3d   : > { %1246 = vmatprep.subr.bf16.mxu0 %v1245_v30  ;;  %v1247_v36 = vpack.c.bf16 %v718_v32, %v714_v31  ;;  %v542_v37 = vcombine.high %v520_v51, %v520_v51  ;;  %v544_v38 = vcombine.high %v534_v54, %v534_v54  ;;  %v1566_v42 = vrot.slane %v512_v57, %v1509_v15 }
  0x3e   : > { %1278 = vmatprep.subr.bf16.mxu1 %v1277_v33  ;;  %v1279_v39 = vpack.c.bf16 %v720_v35, %v716_v34  ;;  %v1569_v43 = vrot.slane %v513_v58, %v1509_v15 }
  0x3f   : > { %v585_v29 = vrot.slane %v542_v37, %v1475_v17  ;;  %v593_v44 = vrot.slane %v542_v37, %v1516_v40  ;;  %v581_v45 = vrot.slane %v542_v37, %v1519_v41  ;;  %v589_v46 = vrot.slane %v542_v37, %v1479_v23 }
  0x40   : > { %1248 = vmatpush1.bf16.msra.mxu0 %v1247_v36  ;;  %1280 = vmatpush1.bf16.msra.mxu1 %v1279_v39  ;;  %v601_v51 = vrot.slane %v544_v38, %v1475_v17  ;;  %v609_v54 = vrot.slane %v544_v38, %v1516_v40  ;;  %v597_v57 = vrot.slane %v544_v38, %v1519_v41 }
  0x41   : > { %v723_v59 = vmul.f32 %v585_v29, %v1523_v47  ;;  %v727_v15 = vmul.f32 %v585_v29, %v1525_v48  ;;  %v725_v58 = vmul.f32 %v593_v44, %v1527_v49  ;;  %v729_v60 = vmul.f32 %v593_v44, %v1529_v50 }
  0x42   : > { %v722_v61 = vmul.f32 %v581_v45, %v1532_v52  ;;  %v726_v62 = vmul.f32 %v581_v45, %v1534_v53  ;;  %v724_v63 = vmul.f32 %v589_v46, %v1537_v55  ;;  %v728_v1 = vmul.f32 %v589_v46, %v1539_v56 }
  0x43   : > { %v1249_v2 = vpack.c.bf16 %v727_v15, %v723_v59  ;;  %v1281_v3 = vpack.c.bf16 %v729_v60, %v725_v58  ;;  %v731_v6 = vmul.f32 %v601_v51, %v1523_v47  ;;  %v735_v7 = vmul.f32 %v601_v51, %v1525_v48 }
  0x44   : > { %v1251_v11 = vpack.c.bf16 %v726_v62, %v722_v61  ;;  %v1283_v12 = vpack.c.bf16 %v728_v1, %v724_v63  ;;  %v733_v13 = vmul.f32 %v609_v54, %v1527_v49  ;;  %v737_v14 = vmul.f32 %v609_v54, %v1529_v50 }
  0x45   : > { %1250 = vmatprep.subr.bf16.mxu0 %v1249_v2  ;;  %1282 = vmatprep.subr.bf16.mxu1 %v1281_v3  ;;  %v1253_v16 = vpack.c.bf16 %v735_v7, %v731_v6  ;;  %v730_v18 = vmul.f32 %v597_v57, %v1532_v52  ;;  %v734_v19 = vmul.f32 %v597_v57, %v1534_v53 }
  0x46   : > { %1252 = vmatpush1.bf16.msra.mxu0 %v1251_v11  ;;  %1284 = vmatpush1.bf16.msra.mxu1 %v1283_v12  ;;  %v1285_v20 = vpack.c.bf16 %v737_v14, %v733_v13  ;;  %v605_v21 = vrot.slane %v544_v38, %v1479_v23  ;;  %v617_v22 = vrot.slane %v1566_v42, %v1475_v17 }
  0x47   : > { %1254 = vmatprep.subr.bf16.mxu0 %v1253_v16  ;;  %v1255_v24 = vpack.c.bf16 %v734_v19, %v730_v18  ;;  %v625_v25 = vrot.slane %v1566_v42, %v1516_v40  ;;  %v613_v26 = vrot.slane %v1566_v42, %v1519_v41  ;;  %v621_v27 = vrot.slane %v1566_v42, %v1479_v23 }
  0x48   : > { %1286 = vmatprep.subr.bf16.mxu1 %v1285_v20  ;;  %v732_v30 = vmul.f32 %v605_v21, %v1537_v55  ;;  %v736_v31 = vmul.f32 %v605_v21, %v1539_v56  ;;  %v739_v32 = vmul.f32 %v617_v22, %v1523_v47  ;;  %v743_v33 = vmul.f32 %v617_v22, %v1525_v48 }
  0x49   : > { %v741_v34 = vmul.f32 %v625_v25, %v1527_v49  ;;  %v745_v35 = vmul.f32 %v625_v25, %v1529_v50  ;;  %v738_v36 = vmul.f32 %v613_v26, %v1532_v52  ;;  %v742_v37 = vmul.f32 %v613_v26, %v1534_v53 }
  0x4a   : > { %1256 = vmatpush1.bf16.msra.mxu0 %v1255_v24  ;;  %v1287_v38 = vpack.c.bf16 %v736_v31, %v732_v30  ;;  %v1257_v39 = vpack.c.bf16 %v743_v33, %v739_v32  ;;  %v740_v29 = vmul.f32 %v621_v27, %v1537_v55  ;;  %v744_v44 = vmul.f32 %v621_v27, %v1539_v56 }
  0x4b   : > { %v1289_v45 = vpack.c.bf16 %v745_v35, %v741_v34  ;;  %v1259_v46 = vpack.c.bf16 %v742_v37, %v738_v36  ;;  %v633_v51 = vrot.slane %v1569_v43, %v1475_v17  ;;  %v641_v54 = vrot.slane %v1569_v43, %v1516_v40 }
  0x4c   : > { %1288 = vmatpush1.bf16.msra.mxu1 %v1287_v38  ;;  %1258 = vmatprep.subr.bf16.mxu0 %v1257_v39  ;;  %v1291_v57 = vpack.c.bf16 %v744_v44, %v740_v29  ;;  %v629_v59 = vrot.slane %v1569_v43, %v1519_v41  ;;  %v637_v15 = vrot.slane %v1569_v43, %v1479_v23 }
  0x4d   : > { %1290 = vmatprep.subr.bf16.mxu1 %v1289_v45  ;;  %v747_v58 = vmul.f32 %v633_v51, %v1523_v47  ;;  %v751_v60 = vmul.f32 %v633_v51, %v1525_v48  ;;  %v749_v61 = vmul.f32 %v641_v54, %v1527_v49  ;;  %v753_v62 = vmul.f32 %v641_v54, %v1529_v50 }
  0x4e   : > { %1260 = vmatpush1.bf16.msra.mxu0 %v1259_v46  ;;  %v746_v63 = vmul.f32 %v629_v59, %v1532_v52  ;;  %v750_v1 = vmul.f32 %v629_v59, %v1534_v53  ;;  %v748_v2 = vmul.f32 %v637_v15, %v1537_v55  ;;  %v752_v3 = vmul.f32 %v637_v15, %v1539_v56  ;;  %v770_v46 = vld [vmem:[%s231_s6] sm:$0xff] }
  0x4f   : > { %v1261_v6 = vpack.c.bf16 %v751_v60, %v747_v58  ;;  %v1293_v7 = vpack.c.bf16 %v753_v62, %v749_v61  ;;  %v543_v11 = vcombine.high %v1566_v42, %v1566_v42  ;;  %v545_v12 = vcombine.high %v1569_v43, %v1569_v43 }
  0x50   : > { %1292 = vmatpush1.bf16.msra.mxu1 %v1291_v57  ;;  %v1263_v13 = vpack.c.bf16 %v750_v1, %v746_v63  ;;  %v1295_v14 = vpack.c.bf16 %v752_v3, %v748_v2  ;;  %v289_v59 = vsub.s32 4, %v1462_v8 }
  0x51   : > { %1262 = vmatprep.subr.bf16.mxu0 %v1261_v6  ;;  %1294 = vmatprep.subr.bf16.mxu1 %v1293_v7  ;;  %v649_v16 = vrot.slane %v543_v11, %v1475_v17  ;;  %v657_v18 = vrot.slane %v543_v11, %v1516_v40  ;;  %v645_v19 = vrot.slane %v543_v11, %v1519_v41 }
  0x52   : > { %1264 = vmatpush1.bf16.msra.mxu0 %v1263_v13  ;;  %v653_v20 = vrot.slane %v543_v11, %v1479_v23  ;;  %v665_v21 = vrot.slane %v545_v12, %v1475_v17  ;;  %v673_v42 = vrot.slane %v545_v12, %v1516_v40  ;;  %v661_v43 = vrot.slane %v545_v12, %v1519_v41 }
  0x53   : > { %v755_v22 = vmul.f32 %v649_v16, %v1523_v47  ;;  %v759_v24 = vmul.f32 %v649_v16, %v1525_v48  ;;  %v757_v25 = vmul.f32 %v657_v18, %v1527_v49  ;;  %v761_v26 = vmul.f32 %v657_v18, %v1529_v50 }
  0x54   : > { %1296 = vmatpush1.bf16.msra.mxu1 %v1295_v14  ;;  %v754_v27 = vmul.f32 %v645_v19, %v1532_v52  ;;  %v758_v30 = vmul.f32 %v645_v19, %v1534_v53  ;;  %v756_v17 = vmul.f32 %v653_v20, %v1537_v55  ;;  %v760_v31 = vmul.f32 %v653_v20, %v1539_v56 }
  0x55   : > { %v1265_v40 = vpack.c.bf16 %v759_v24, %v755_v22  ;;  %v1297_v32 = vpack.c.bf16 %v761_v26, %v757_v25  ;;  %v763_v33 = vmul.f32 %v665_v21, %v1523_v47  ;;  %v767_v34 = vmul.f32 %v665_v21, %v1525_v48 }
  0x56   : > { %v1267_v35 = vpack.c.bf16 %v758_v30, %v754_v27  ;;  %v1299_v36 = vpack.c.bf16 %v760_v31, %v756_v17  ;;  %v765_v37 = vmul.f32 %v673_v42, %v1527_v49  ;;  %v769_v38 = vmul.f32 %v673_v42, %v1529_v50 }
  0x57   : > { %1266 = vmatprep.subr.bf16.mxu0 %v1265_v40  ;;  %1298 = vmatprep.subr.bf16.mxu1 %v1297_v32  ;;  %v1269_v39 = vpack.c.bf16 %v767_v34, %v763_v33  ;;  %v762_v29 = vmul.f32 %v661_v43, %v1532_v52  ;;  %v766_v44 = vmul.f32 %v661_v43, %v1534_v53  ;;  %v771_v53 = vld [vmem:[%s231_s6 + $0x8] sm:$0xff] }
  0x58   : > { %1268 = vmatpush1.bf16.msra.mxu0 %v1267_v35  ;;  %1300 = vmatpush1.bf16.msra.mxu1 %v1299_v36  ;;  %v1301_v45 = vpack.c.bf16 %v769_v38, %v765_v37  ;;  %v669_v47 = vrot.slane %v545_v12, %v1479_v23  ;;  %v772_v23 = vld [vmem:[%s231_s6 + $0x10] sm:$0xff] }
  0x59   : > { %1270 = vmatprep.subr.bf16.mxu0 %v1269_v39  ;;  %v1271_v48 = vpack.c.bf16 %v766_v44, %v762_v29 }
  0x5a   : > { %1302 = vmatprep.subr.bf16.mxu1 %v1301_v45  ;;  %v764_v49 = vmul.f32 %v669_v47, %v1537_v55  ;;  %v768_v50 = vmul.f32 %v669_v47, %v1539_v56  ;;  %v260_v55 = vmul.f32 2.5, %v1464_v9  ;;  %v261_v56 = vmul.f32 2.5, %v1466_v10 }
  0x5c   : > { %1272 = vmatpush1.bf16.msra.mxu0 %v1271_v48  ;;  %v1303_v52 = vpack.c.bf16 %v768_v50, %v764_v49  ;;  %v262_v51 = vmax.f32 %v260_v55, 0.0  ;;  %v263_v54 = vmax.f32 %v261_v56, 0.0 }
  0x5e   : > { %1304 = vmatpush1.bf16.msra.mxu1 %v1303_v52  ;;  %v264_v57 = vmin.f32 %v262_v51, 5.0  ;;  %v265_v15 = vmin.f32 %v263_v54, 5.0 }
  0x5f   : > { %850 = vmatmul.mubr.f32.vlgmr.msra.gmra.mrb[0].mxu0 %v770_v46 }
  0x60   : > { %855 = vmatprep.mubr.f32.mxu0 %v1388_v0  ;;  %v286_v58 = vrot.slane %v264_v57, %v1519_v41  ;;  %v290_v60 = vrot.slane %v264_v57, %v289_v59  ;;  %v294_v61 = vrot.slane %v265_v15, %v1519_v41  ;;  %v298_v62 = vrot.slane %v265_v15, %v289_v59 }
  0x61   : > { %933 = vmatmul.mubr.f32.vlgmr.msra.gmra.mrb[0].mxu1 %v770_v46 }
  0x62   : > { %938 = vmatprep.mubr.f32.mxu1 %v1388_v0  ;;  %v310_v63 = vrot.slane %v290_v60, %v1519_v41  ;;  %v314_v9 = vrot.slane %v294_v61, %v1519_v41  ;;  %v318_v10 = vrot.slane %v298_v62, %v1519_v41 }
  0x63   : > { %856 = vmatmul.mubr.f32.gmra.mrb[2].mxu0 %v771_v53 }
  0x64   : > { %861 = vmatprep.mubr.f32.mxu0 %v1388_v0  ;;  %v320_v2 = vsub.f32 %v310_v63, %v1482_v28  ;;  %v321_v8 = vsub.f32 %v314_v9, %v1482_v28  ;;  %v322_v3 = vsub.f32 %v318_v10, %v1482_v28 }
  0x65   : > { %939 = vmatmul.mubr.f32.gmra.mrb[2].mxu1 %v771_v53 }
  0x66   : > { %944 = vmatprep.mubr.f32.mxu1 %v1388_v0  ;;  %v306_v0 = vrot.slane %v286_v58, %v1519_v41  ;;  %v324_v7 = vand.u32 2147483647, %v320_v2  ;;  %v325_v11 = vand.u32 2147483647, %v321_v8  ;;  %v326_v12 = vand.u32 2147483647, %v322_v3 }
  0x67   : > { %862 = vmatmul.mubr.f32.gmra.mrb[4].mxu0 %v772_v23 }
  0x68   : > { %v319_v1 = vsub.f32 %v306_v0, %v1482_v28  ;;  %v328_v14 = vsub.f32 1.0, %v324_v7  ;;  %v329_v16 = vsub.f32 1.0, %v325_v11  ;;  %v330_v18 = vsub.f32 1.0, %v326_v12 }
  0x69   : > { %945 = vmatmul.mubr.f32.gmra.mrb[4].mxu1 %v772_v23 }
  0x6a   : > { %v323_v6 = vand.u32 2147483647, %v319_v1  ;;  %v1678_v20 = vmax.f32 %v328_v14, 0.0  ;;  %v1680_v41 = vmax.f32 %v329_v16, 0.0  ;;  %v1682_v42 = vmax.f32 %v330_v18, 0.0 }
  0x6c   : > { %v327_v13 = vsub.f32 1.0, %v323_v6 }
  0x6e   : > { %v1676_v19 = vmax.f32 %v327_v13, 0.0 }
 0x132   : > { %v851_v21 = vpop.f32.mrb[0].mxu0 }
 0x133   : > { %v987_v43 = vmul.f32 %v851_v21, %v1676_v19  ;;  %v853_v28 = vpop.f32.mrb[1].mxu0 }
 0x134   : > { %v934_v22 = vpop.f32.mrb[0].mxu1  ;;  %v988_v24 = vmul.f32 %v853_v28, %v1678_v20 }
 0x135   : > { %v999_v25 = vrot.slane %v987_v43, 4  ;;  %v989_v26 = vmul.f32 %v934_v22, %v1680_v41  ;;  %v936_v27 = vpop.f32.mrb[1].mxu1 }
 0x136   : > { %v1005_v30 = vrot.slane %v988_v24, 4  ;;  %v990_v17 = vmul.f32 %v936_v27, %v1682_v42  ;;  %v857_v31 = vpop.f32.mrb[2].mxu0 }
 0x137   : > { %v1000_v40 = vadd.f32 %v999_v25, %v987_v43  ;;  %v1011_v32 = vrot.slane %v989_v26, 4  ;;  %v991_v33 = vmul.f32 %v857_v31, %v1676_v19  ;;  %v859_v34 = vpop.f32.mrb[3].mxu0 }
 0x138   : > { %v1006_v35 = vadd.f32 %v1005_v30, %v988_v24  ;;  %v1017_v36 = vrot.slane %v990_v17, 4  ;;  %v940_v37 = vpop.f32.mrb[2].mxu1  ;;  %v992_v38 = vmul.f32 %v859_v34, %v1678_v20 }
 0x139   : > { %v1001_v39 = vrot.slane %v1000_v40, 2  ;;  %v1012_v29 = vadd.f32 %v1011_v32, %v989_v26  ;;  %v1023_v44 = vrot.slane %v991_v33, 4  ;;  %v993_v45 = vmul.f32 %v940_v37, %v1680_v41  ;;  %v942_v47 = vpop.f32.mrb[3].mxu1 }
 0x13a   : > { %v1007_v48 = vrot.slane %v1006_v35, 2  ;;  %v1018_v49 = vadd.f32 %v1017_v36, %v990_v17  ;;  %v1029_v50 = vrot.slane %v992_v38, 4  ;;  %v994_v52 = vmul.f32 %v942_v47, %v1682_v42  ;;  %v863_v46 = vpop.f32.mrb[4].mxu0 }
 0x13b   : > { %v1002_v53 = vadd.f32 %v1001_v39, %v1000_v40  ;;  %v1013_v23 = vrot.slane %v1012_v29, 2  ;;  %v1024_v55 = vadd.f32 %v1023_v44, %v991_v33  ;;  %v1035_v56 = vrot.slane %v993_v45, 4  ;;  %v865_v51 = vpop.f32.mrb[5].mxu0 }
 0x13c   : > { %v1008_v54 = vadd.f32 %v1007_v48, %v1006_v35  ;;  %v1019_v57 = vrot.slane %v1018_v49, 2  ;;  %v1030_v59 = vadd.f32 %v1029_v50, %v992_v38  ;;  %v1041_v15 = vrot.slane %v994_v52, 4  ;;  %v946_v58 = vpop.f32.mrb[4].mxu1 }
 0x13d   : > { %v1003_v60 = vrot.slane %v1002_v53, 1  ;;  %v1014_v61 = vadd.f32 %v1013_v23, %v1012_v29  ;;  %v1025_v62 = vrot.slane %v1024_v55, 2  ;;  %v1036_v0 = vadd.f32 %v1035_v56, %v993_v45  ;;  %v948_v63 = vpop.f32.mrb[5].mxu1 }
 0x13e   : > { %v1009_v9 = vrot.slane %v1008_v54, 1  ;;  %v1020_v10 = vadd.f32 %v1019_v57, %v1018_v49  ;;  %v1031_v1 = vrot.slane %v1030_v59, 2  ;;  %v1042_v2 = vadd.f32 %v1041_v15, %v994_v52 }
 0x13f   : > { %v1004_v8 = vadd.f32 %v1003_v60, %v1002_v53  ;;  %v1015_v3 = vrot.slane %v1014_v61, 1  ;;  %v1026_v6 = vadd.f32 %v1025_v62, %v1024_v55  ;;  %v1037_v7 = vrot.slane %v1036_v0, 2 }
 0x140   : > { %v1010_v11 = vadd.f32 %v1009_v9, %v1008_v54  ;;  %v1021_v12 = vrot.slane %v1020_v10, 1  ;;  %v1032_v13 = vadd.f32 %v1031_v1, %v1030_v59  ;;  %v1043_v14 = vrot.slane %v1042_v2, 2 }
 0x141   : > { %v1016_v16 = vadd.f32 %v1015_v3, %v1014_v61  ;;  %v1027_v18 = vrot.slane %v1026_v6, 1  ;;  %v1038_v21 = vadd.f32 %v1037_v7, %v1036_v0  ;;  %v995_v43 = vmul.f32 %v863_v46, %v1676_v19 }
 0x142   : > { %v1083_v28 = vcombine.low %v1004_v8, %v1010_v11  ;;  %v1022_v22 = vadd.f32 %v1021_v12, %v1020_v10  ;;  %v1033_v24 = vrot.slane %v1032_v13, 1  ;;  %v1044_v25 = vadd.f32 %v1043_v14, %v1042_v2 }
 0x143   : > { %v1028_v26 = vadd.f32 %v1027_v18, %v1026_v6  ;;  %v1039_v27 = vrot.slane %v1038_v21, 1  ;;  %v1047_v30 = vrot.slane %v995_v43, 4  ;;  %v997_v17 = vmul.f32 %v946_v58, %v1680_v41 }
 0x144   : > { %v1084_v31 = vcombine.low %v1016_v16, %v1022_v22  ;;  %v1034_v40 = vadd.f32 %v1033_v24, %v1032_v13  ;;  %v1045_v32 = vrot.slane %v1044_v25, 1  ;;  %v996_v33 = vmul.f32 %v865_v51, %v1678_v20 }
 0x145   : > { %v1040_v34 = vadd.f32 %v1039_v27, %v1038_v21  ;;  %v1048_v35 = vadd.f32 %v1047_v30, %v995_v43  ;;  %v1059_v36 = vrot.slane %v997_v17, 4  ;;  %v998_v37 = vmul.f32 %v948_v63, %v1682_v42 }
 0x146   : > { %v1085_v19 = vcombine.low %v1028_v26, %v1034_v40  ;;  %v1046_v38 = vadd.f32 %v1045_v32, %v1044_v25  ;;  %v1053_v39 = vrot.slane %v996_v33, 4 }
 0x147   : > { %v1049_v29 = vrot.slane %v1048_v35, 2  ;;  %v1060_v44 = vadd.f32 %v1059_v36, %v997_v17  ;;  %v1065_v45 = vrot.slane %v998_v37, 4 }
 0x148   : > { %v1089_v47 = vrot.slane %v1085_v19, 7  ;;  %v1086_v41 = vcombine.low %v1040_v34, %v1046_v38  ;;  %v1054_v48 = vadd.f32 %v1053_v39, %v996_v33 }
 0x149   : > { %v1050_v49 = vadd.f32 %v1049_v29, %v1048_v35  ;;  %v1061_v50 = vrot.slane %v1060_v44, 2  ;;  %v1066_v52 = vadd.f32 %v1065_v45, %v998_v37 }
 0x14a   : > { %v1091_v20 = vsel %vm1090_vm0, %v1089_v47, %v1083_v28  ;;  %v1099_v46 = vrot.slane %v1086_v41, 7  ;;  %v1055_v53 = vrot.slane %v1054_v48, 2 }
 0x14b   : > { %v1093_v23 = vsel %vm1092_vm1, %v1089_v47, %v1091_v20  ;;  %v1051_v42 = vrot.slane %v1050_v49, 1  ;;  %v1062_v55 = vadd.f32 %v1061_v50, %v1060_v44  ;;  %v1067_v56 = vrot.slane %v1066_v52, 2 }
 0x14c   : > { %v1100_v51 = vsel %vm1090_vm0, %v1099_v46, %v1084_v31  ;;  %v1056_v54 = vadd.f32 %v1055_v53, %v1054_v48 }
 0x14d   : > { %v1101_v57 = vsel %vm1092_vm1, %v1099_v46, %v1100_v51  ;;  %v1063_v59 = vrot.slane %v1062_v55, 1  ;;  %v1068_v15 = vadd.f32 %v1067_v56, %v1066_v52  ;;  %v1052_v58 = vadd.f32 %v1051_v42, %v1050_v49 }
 0x14e   : > { %v1057_v60 = vrot.slane %v1056_v54, 1 }
 0x14f   : > { %v1064_v61 = vadd.f32 %v1063_v59, %v1062_v55  ;;  %v1069_v62 = vrot.slane %v1068_v15, 1 }
 0x150   : > { %v1058_v0 = vadd.f32 %v1057_v60, %v1056_v54 }
 0x151   : > { %v1070_v63 = vadd.f32 %v1069_v62, %v1068_v15 }
 0x152   : > { %v1087_v9 = vcombine.low %v1052_v58, %v1058_v0 }
 0x153   : > { %v1088_v10 = vcombine.low %v1064_v61, %v1070_v63 }
 0x154   : > { %v1094_v1 = vrot.slane %v1087_v9, 6 }
 0x155   : > { %v1102_v2 = vrot.slane %v1088_v10, 6 }
 0x156   : > { %v1096_v8 = vsel %vm1095_vm2, %v1094_v1, %v1093_v23 }
 0x157   : > { %v1098_v3 = vsel %vm1097_vm3, %v1094_v1, %v1096_v8  ;;  %v1103_v6 = vsel %vm1095_vm2, %v1102_v2, %v1101_v57 }
 0x158   : > { %v1107_v7 = vadd.f32 %v1098_v3, %v1456_v4  ;;  %v1104_v11 = vsel %vm1097_vm3, %v1102_v2, %v1103_v6 }
 0x159   : > { %v1108_v12 = vadd.f32 %v1104_v11, %v1458_v5 }
 0x15a   : > { %1109 = vst [vmem:[%s250_s9] sm:$0x77] %v1107_v7 }
 0x15b   : > { %1110 = vst [vmem:[%s250_s9 + $0x8] sm:$0x77] %v1108_v12 }
 0x15c PF: > { %s13_s16 = sadd.s32 1, %s1386_s16   ;;  %s1724_s12 = smov %s1378_s14 }
 0x15d   : > { %p10_p7 = scmp.ge.s32.totalorder %s13_s16, 6   ;;  %s1725_s13 = smov %s1382_s15 }
 0x15e   : > { %s1726_s14 = smov %s1729_s17  ;;  %s1727_s15 = smov %s1733_s18 }
 0x15f   :  { %12 = sbr.rel (!%p10_p7) target bundleno = 3 (0x3), region = 68 }

</bundles_post_ra>
